<compile_context>
chip_gen: v6e
topology: v6e:2x2x1
jax: 0.10.0
libtpu: 0.0.40
codegen_flags: <defaults>
</compile_context>

<pallas_src>
import numpy as np
import jax
import jax.numpy as jnp
from jax.experimental import pallas as pl
from jax.experimental.pallas import tpu as pltpu


# ---------------------------------------------------------------------------
# MPO rank computation (mirrors MPO.compute_rank / compute_rank_position)
# ---------------------------------------------------------------------------
def compute_mpo_ranks(mpo_input_shape, mpo_output_shape, truncate_num=None):
    n = len(mpo_input_shape)
    ranks = [1] * (n + 1)
    for s in range(1, n):
        left, right = 1, 1
        for i in range(0, s):
            left *= mpo_input_shape[i] * mpo_output_shape[i]
        for i in range(s, n):
            right *= mpo_input_shape[i] * mpo_output_shape[i]
        if truncate_num is None:
            ranks[s] = min(left, right)
        else:
            ranks[s] = min(int(truncate_num), left, right)
    return ranks


def new_mpo2matrix(tensor_set, in_features, out_features):
    """Contract MPO cores into a (in_features, out_features) matrix. Mirrors
    MPO.new_mpo2matrix (sequential tensordot + direct reshape, no permutation)."""
    t = tensor_set[0]
    for core in tensor_set[1:]:
        t = jnp.tensordot(t, core, axes=([t.ndim - 1], [0]))
    return t.reshape(in_features, out_features)


def _reconstruct_padded_weight(tensor_set, in_features, out_features, Kp, Np, dtype):
    """Reconstruct the dense weight, cast to the compute dtype and pad to the
    tile-aligned (Kp, Np) buffer in one fused (jit-able) step."""
    # TODO(synk): cache this padded weight across forwards when the cores are
    # static, or (long term) contract x through the MPO cores directly instead
    # of materializing the dense (K, N) matrix every forward.
    w = new_mpo2matrix(tensor_set, in_features, out_features).astype(dtype)
    if (Kp, Np) != (in_features, out_features):
        w = jnp.pad(w, ((0, Kp - in_features), (0, Np - out_features)))
    return w


def _round_up(x, m):
    return (x + m - 1) // m * m


def _sublane_multiple(dtype):
    itemsize = jnp.dtype(dtype).itemsize
    if itemsize >= 4:
        return 8
    if itemsize == 2:
        return 16
    return 32


def _vmem_cap_bytes():
    """Generation-aware VMEM budget: ~5/8 of physical per-core VMEM, capped."""
    try:
        cap = int(pltpu.get_tpu_info().vmem_capacity_bytes)
    except Exception:
        cap = 64 << 20  # conservative: assume v7x-sized (64 MiB per TC) VMEM
    return int(min(cap * 5 // 8, 96 << 20))


# ---------------------------------------------------------------------------
# Pallas kernels: tiled  out = x @ W + b  with K as the ("arbitrary") reduction
# axis. Partial product computed once; assign on k==0, accumulate on k>0
# (correct for K-grid == 1 as well).
# ---------------------------------------------------------------------------
def _linear_kernel_direct(x_ref, w_ref, b_ref, o_ref):
    """f32 output: accumulate directly into the resident output block."""
    k = pl.program_id(2)
    p = jnp.dot(x_ref[...], w_ref[...], preferred_element_type=jnp.float32)

    @pl.when(k == 0)
    def _():
        o_ref[...] = p

    @pl.when(k > 0)
    def _():
        o_ref[...] += p

    @pl.when(k == pl.num_programs(2) - 1)
    def _():
        o_ref[...] += b_ref[...]


def _linear_kernel_acc(x_ref, w_ref, b_ref, o_ref, acc_ref):
    """Non-f32 output: f32 VMEM scratch accumulator, cast + bias on last step."""
    k = pl.program_id(2)
    p = jnp.dot(x_ref[...], w_ref[...], preferred_element_type=jnp.float32)

    @pl.when(k == 0)
    def _():
        acc_ref[...] = p

    @pl.when(k > 0)
    def _():
        acc_ref[...] += p

    @pl.when(k == pl.num_programs(2) - 1)
    def _():
        o_ref[...] = (acc_ref[...] + b_ref[...]).astype(o_ref.dtype)


# ---------------------------------------------------------------------------
# Wrapper
# ---------------------------------------------------------------------------
def mpo_linear_forward(x, tensor_set, bias, mpo_input_shape, mpo_output_shape,
                       *, compute_dtype=jnp.bfloat16, tm=None, tn=None, tk=None,
                       w_buffers=None):
    in_features = int(np.prod(mpo_input_shape))
    out_features = int(np.prod(mpo_output_shape))
    assert x.shape[-1] == in_features

    ori_shape = x.shape
    out_dtype = x.dtype
    cdtype = jnp.dtype(compute_dtype if compute_dtype is not None else x.dtype)

    x2d = x.reshape(-1, in_features).astype(cdtype)
    M, K, N = x2d.shape[0], in_features, out_features

    # ---- tile selection: MXU-friendly, dtype-aware sublane rounding, 128-lane.
    sub_m = _sublane_multiple(cdtype)
    if tm is None:
        tm = min(512, _round_up(M, sub_m))
    if tn is None:
        tn = min(512, _round_up(N, 128))
    if tk is None:
        tk = min(512, _round_up(K, 128))

    Mp = _round_up(M, tm)
    Np = _round_up(N, tn)
    Kp = _round_up(K, tk)

    # v7x megacore: for small-M shapes with a single (M, N) tile, split N so at
    # least one "parallel" grid axis has >= 2 tiles (keeps the 2nd TC busy).
    if Mp // tm == 1 and Np // tn == 1 and tn >= 256 and tn % 256 == 0:
        tn //= 2
        Np = _round_up(N, tn)

    # Zero-pad x to tile boundaries (zeros contribute nothing to the matmul).
    if (Mp, Kp) != (M, K):
        x2d = jnp.pad(x2d, ((0, Mp - M), (0, Kp - K)))

    # Weight reconstruction fused with cast + pad into the (Kp, Np) buffer.
    w = _reconstruct_padded_weight(tensor_set, K, N, Kp, Np, cdtype)

    # Bias pre-cast to f32 (no per-step VALU cast in the kernel).
    b_f32 = (jnp.zeros((N,), jnp.float32) if bias is None
             else bias.astype(jnp.float32))
    b2d = jnp.pad(b_f32.reshape(1, N), ((0, 0), (0, Np - N)))

    grid = (Mp // tm, Np // tn, Kp // tk)
    n_m, n_n, n_k = grid

    in_bytes = jnp.dtype(cdtype).itemsize
    out_bytes = jnp.dtype(out_dtype).itemsize

    direct = jnp.dtype(out_dtype) == jnp.dtype(jnp.float32)
    if direct:
        kernel = _linear_kernel_direct
        scratch_shapes = []
        acc_bytes = 0
    else:
        kernel = _linear_kernel_acc
        scratch_shapes = [pltpu.VMEM((tm, tn), jnp.float32)]
        acc_bytes = tm * tn * 4

    # Double-buffered input/output tiles (+ accumulator), 2x headroom,
    # capped by a generation-aware VMEM budget.
    vmem_need = (2 * (tm * tk + tk * tn) * in_bytes
                 + 2 * tm * tn * out_bytes
                 + 2 * tn * 4
                 + acc_bytes)
    vmem_limit = int(min(max(2 * vmem_need, 8 << 20), _vmem_cap_bytes()))

    cost = pl.CostEstimate(
        flops=2 * Mp * Kp * Np,
        transcendentals=0,
        bytes_accessed=(Mp * Kp * in_bytes * n_n      # x re-streamed per N tile
                        + Kp * Np * in_bytes * n_m    # W re-streamed per M tile
                        + Mp * Np * out_bytes         # output written once
                        + Np * 4 * n_m * n_k),        # bias tile per (i, k) step
    )

    w_spec_kwargs = {}
    if w_buffers is not None and w_buffers > 2:
        # Optional deeper buffering of the large streamed W operand (v6e sweep).
        w_spec_kwargs["pipeline_mode"] = pl.Buffered(w_buffers)

    out2d = pl.pallas_call(
        kernel,
        out_shape=jax.ShapeDtypeStruct((Mp, Np), out_dtype),
        grid_spec=pltpu.PrefetchScalarGridSpec(
            num_scalar_prefetch=0,
            grid=grid,
            in_specs=[
                pl.BlockSpec((tm, tk), lambda i, j, k: (i, k)),
                pl.BlockSpec((tk, tn), lambda i, j, k: (k, j), **w_spec_kwargs),
                pl.BlockSpec((1, tn), lambda i, j, k: (0, j)),
            ],
            out_specs=pl.BlockSpec((tm, tn), lambda i, j, k: (i, j)),
            scratch_shapes=scratch_shapes,
        ),
        compiler_params=pltpu.CompilerParams(
            dimension_semantics=("parallel", "parallel", "arbitrary"),
            vmem_limit_bytes=vmem_limit,
        ),
        cost_estimate=cost,
    )(x2d, w, b2d)

    out2d = out2d[:M, :N]
    return out2d.reshape(ori_shape[:-1] + (N,))


if __name__ == "__main__":
    # Small shapes consistent with the module:
    # batch=2, seq=8, input_size=32 (= prod mpo_input_shape), output_size=16.
    mpo_input_shape = [4, 4, 2]     # prod = 32 = input_size
    mpo_output_shape = [4, 2, 2]    # prod = 16 = output_size
    trunc_num = 8
    input_size = int(np.prod(mpo_input_shape))
    output_size = int(np.prod(mpo_output_shape))

    ranks = compute_mpo_ranks(mpo_input_shape, mpo_output_shape, trunc_num)
    # ranks == [1, 8, 4, 1] -> cores (1,4,4,8), (8,4,2,4), (4,2,2,1)

    key = jax.random.PRNGKey(0)
    keys = jax.random.split(key, len(mpo_input_shape) + 2)

    # Deterministic synthetic MPO cores of shape (r_k, i_k, o_k, r_{k+1}).
    # TODO(synk): the SVD-based matrix2mpo decomposition of an nn.Linear weight
    # is an init-time, host-side procedure; cores are initialized directly here
    # with deterministic random values of the exact shapes it would produce.
    tensor_set = []
    for k in range(len(mpo_input_shape)):
        shape = (ranks[k], mpo_input_shape[k], mpo_output_shape[k], ranks[k + 1])
        tensor_set.append(0.1 * jax.random.normal(keys[k], shape, dtype=jnp.float32))

    bias = 0.1 * jax.random.normal(keys[-2], (output_size,), dtype=jnp.float32)
    x = jax.random.normal(keys[-1], (2, 8, input_size), dtype=jnp.float32)

    # Pure-JAX reference with identical semantics to the PyTorch forward.
    w_ref = new_mpo2matrix(tensor_set, input_size, output_size)
    ref = (x.reshape(-1, input_size) @ w_ref + bias).reshape(
        x.shape[:-1] + (output_size,))

    # Default path: bf16 MXU compute, f32 accumulation directly in the output
    # block (no VMEM scratch). Loose tolerance (bf16 operands).
    out = mpo_linear_forward(x, tensor_set, bias,
                             mpo_input_shape, mpo_output_shape)
    out = jax.block_until_ready(out)
    assert out.shape == (2, 8, output_size)
    np.testing.assert_allclose(np.asarray(out), np.asarray(ref),
                               rtol=5e-2, atol=1e-2)

    # Full-f32 compute path (tight tolerance).
    out_f32 = mpo_linear_forward(x, tensor_set, bias,
                                 mpo_input_shape, mpo_output_shape,
                                 compute_dtype=jnp.float32)
    out_f32 = jax.block_until_ready(out_f32)
    np.testing.assert_allclose(np.asarray(out_f32), np.asarray(ref),
                               rtol=1e-5, atol=1e-5)

    # bf16 inputs/outputs: exercises the VMEM f32-scratch accumulator kernel.
    out_bf16 = mpo_linear_forward(x.astype(jnp.bfloat16), tensor_set, bias,
                                  mpo_input_shape, mpo_output_shape)
    out_bf16 = jax.block_until_ready(out_bf16)
    np.testing.assert_allclose(np.asarray(out_bf16, dtype=np.float32),
                               np.asarray(ref), rtol=5e-2, atol=2e-2)

    print("KERNEL_OK")
</pallas_src>

<mosaic_0001>
module attributes {stable_mosaic.version = 11 : i64} {
  func.func @_linear_kernel_direct(%arg0: i32, %arg1: i32, %arg2: i32, %arg3: memref<16x128xbf16, #tpu.memory_space<vmem>>, %arg4: memref<128x128xbf16, #tpu.memory_space<vmem>>, %arg5: memref<1x128xf32, #tpu.memory_space<vmem>>, %arg6: memref<16x128xf32, #tpu.memory_space<vmem>>) attributes {dimension_semantics = [#tpu.dimension_semantics<parallel>, #tpu.dimension_semantics<parallel>, #tpu.dimension_semantics<arbitrary>], iteration_bounds = array<i64: 1, 1, 1>, scalar_prefetch = 0 : i64, scratch_operands = 0 : i64, tpu.core_type = #tpu.core_type<tc>, window_params = [{transform_indices = @transform_0, window_bounds = array<i64: 16, 128>}, {transform_indices = @transform_1, window_bounds = array<i64: 128, 128>}, {transform_indices = @transform_2, window_bounds = array<i64: 1, 128>}, {transform_indices = @transform_3, window_bounds = array<i64: 16, 128>}]} {
    %c0 = arith.constant 0 : index
    %c0_0 = arith.constant 0 : index
    %0 = vector.load %arg3[%c0, %c0_0] : memref<16x128xbf16, #tpu.memory_space<vmem>>, vector<16x128xbf16>
    %c0_1 = arith.constant 0 : index
    %c0_2 = arith.constant 0 : index
    %1 = vector.load %arg4[%c0_1, %c0_2] : memref<128x128xbf16, #tpu.memory_space<vmem>>, vector<128x128xbf16>
    %cst = arith.constant dense<0.000000e+00> : vector<16x128xf32>
    %2 = tpu.matmul %0, %1, %cst {dimension_numbers = #tpu.dot_dimension_numbers<[1], [0], [0], [1], [0, 0, 1, 1], [], []>} : vector<16x128xbf16>, vector<128x128xbf16>, vector<16x128xf32> -> vector<16x128xf32>
    %c0_i32 = arith.constant 0 : i32
    %3 = arith.cmpi eq, %arg2, %c0_i32 : i32
    %4 = arith.extui %3 : i1 to i32
    %c0_i32_3 = arith.constant 0 : i32
    %5 = arith.cmpi ne, %4, %c0_i32_3 : i32
    scf.if %5 {
      %c0_8 = arith.constant 0 : index
      %c0_9 = arith.constant 0 : index
      %12 = vector.load %arg6[%c0_8, %c0_9] : memref<16x128xf32, #tpu.memory_space<vmem>>, vector<16x128xf32>
      tpu.vector_store %arg6[%c0_8, %c0_9], %2 {strides = array<i32>} : memref<16x128xf32, #tpu.memory_space<vmem>>, vector<16x128xf32>,
    } else {
    }
    %c0_i32_4 = arith.constant 0 : i32
    %6 = arith.cmpi sgt, %arg2, %c0_i32_4 : i32
    %7 = arith.extui %6 : i1 to i32
    %c0_i32_5 = arith.constant 0 : i32
    %8 = arith.cmpi ne, %7, %c0_i32_5 : i32
    scf.if %8 {
      %c0_8 = arith.constant 0 : index
      %c0_9 = arith.constant 0 : index
      %12 = vector.load %arg6[%c0_8, %c0_9] : memref<16x128xf32, #tpu.memory_space<vmem>>, vector<16x128xf32>
      %13 = arith.addf %12, %2 : vector<16x128xf32>
      %c0_10 = arith.constant 0 : index
      %c0_11 = arith.constant 0 : index
      %14 = vector.load %arg6[%c0_10, %c0_11] : memref<16x128xf32, #tpu.memory_space<vmem>>, vector<16x128xf32>
      tpu.vector_store %arg6[%c0_10, %c0_11], %13 {strides = array<i32>} : memref<16x128xf32, #tpu.memory_space<vmem>>, vector<16x128xf32>,
    } else {
    }
    %c0_i32_6 = arith.constant 0 : i32
    %9 = arith.cmpi eq, %arg2, %c0_i32_6 : i32
    %10 = arith.extui %9 : i1 to i32
    %c0_i32_7 = arith.constant 0 : i32
    %11 = arith.cmpi ne, %10, %c0_i32_7 : i32
    scf.if %11 {
      %c0_8 = arith.constant 0 : index
      %c0_9 = arith.constant 0 : index
      %12 = vector.load %arg6[%c0_8, %c0_9] : memref<16x128xf32, #tpu.memory_space<vmem>>, vector<16x128xf32>
      %c0_10 = arith.constant 0 : index
      %c0_11 = arith.constant 0 : index
      %13 = vector.load %arg5[%c0_10, %c0_11] : memref<1x128xf32, #tpu.memory_space<vmem>>, vector<1x128xf32>
      %14 = vector.broadcast %13 : vector<1x128xf32> to vector<16x128xf32>
      %15 = arith.addf %12, %14 : vector<16x128xf32>
      %c0_12 = arith.constant 0 : index
      %c0_13 = arith.constant 0 : index
      %16 = vector.load %arg6[%c0_12, %c0_13] : memref<16x128xf32, #tpu.memory_space<vmem>>, vector<16x128xf32>
      tpu.vector_store %arg6[%c0_12, %c0_13], %15 {strides = array<i32>} : memref<16x128xf32, #tpu.memory_space<vmem>>, vector<16x128xf32>,
    } else {
    }
    return
  }
  func.func @transform_0(%arg0: i32, %arg1: i32, %arg2: i32) -> (i32, i32) {
    %c0_i32 = arith.constant 0 : i32
    return %arg0, %arg2 : i32, i32
  }
  func.func @transform_1(%arg0: i32, %arg1: i32, %arg2: i32) -> (i32, i32) {
    %c0_i32 = arith.constant 0 : i32
    return %arg2, %arg1 : i32, i32
  }
  func.func @transform_2(%arg0: i32, %arg1: i32, %arg2: i32) -> (i32, i32) {
    %c0_i32 = arith.constant 0 : i32
    %c0_i32_0 = arith.constant 0 : i32
    return %c0_i32, %arg1 : i32, i32
  }
  func.func @transform_3(%arg0: i32, %arg1: i32, %arg2: i32) -> (i32, i32) {
    %c0_i32 = arith.constant 0 : i32
    return %arg0, %arg1 : i32, i32
  }
}

</mosaic_0001>

<bundles_post_ra>
// kernel: tpu_custom_call.1
= control target key start
LH: loop header
LB: loop body
LE: loop exit
PB: predicated region body
PF: predicated region fallthrough
CT: control target
= control target key end

     0   :  { %8 = vsyncpa [#allocation3], 0  ;;  %s371_s0 = inlined_call_operand.hbm [shape: bf16[16,128], index: 0, kind: input, shape index: {}]   ;;  %s372_s1 = inlined_call_operand.hbm [shape: bf16[128,128], index: 1, kind: input, shape index: {}]   ;;  %s373_s2 = inlined_call_operand.vmem [shape: f32[1,128], index: 2, kind: input, shape index: {}]   ;;  %s374_s3 = inlined_call_operand.hbm [shape: f32[16,128], index: 3, kind: output, shape index: {}]  }
   0x1   :  { %9 = vsyncpa [#allocation6], 0 }
   0x2   :  { %10 = vsyncpa [#allocation4], 0  ;;  %s330_s12 = smov [#allocation2]  }
   0x3   :  { %s16_s13 = sshll.u32 %s330_s12, 4  ;;  %s17_s13 = int_to_ptr.vmem [resolvable:$true] %s16_s13 }
   0x4   :  { %s272_s14 = scalar_lea.vmem %s17_s13, 128  ;;  %p277_p1 = scmp.lt.s32.totalorder %s17_s13, %s17_s13 }
   0x5   :  { %p273_p0 = scmp.ne.s32.totalorder %s17_s13, %s272_s14  ;;  %p278_p2 = scmp.lt.s32.totalorder %s272_s14, %s272_s14 }
   0x7   :  { %p279_p3 = por %p278_p2, %p277_p1 }
   0x9   :  { %p280_p4 = pnand %p279_p3, %p273_p0 }
   0xb   :  { %283 = shalt.err (!%p280_p4)
}
   0xc   :  { %s331_s15 = smov 64   ;;  %s332_s16 = smov 4  }
   0xd   :  { %22 = dma.hbm_to_vmem [thread:$0]  %s371_s0, 128, %s17_s13, [#allocation3], %s331_s15, %s331_s15, %s332_s16  }
   0xe   :  { %s333_s19 = smov [#allocation5]  }
   0xf   :  { %s28_s20 = sshll.u32 %s333_s19, 4  ;;  %s29_s20 = int_to_ptr.vmem [resolvable:$true] %s28_s20 }
  0x10   :  { %s292_s21 = scalar_lea.vmem %s29_s20, 1024  ;;  %p297_p6 = scmp.lt.s32.totalorder %s29_s20, %s29_s20 }
  0x11   :  { %p293_p5 = scmp.ne.s32.totalorder %s29_s20, %s292_s21  ;;  %p298_p7 = scmp.lt.s32.totalorder %s292_s21, %s292_s21 }
  0x13   :  { %p299_p8 = por %p298_p7, %p297_p6 }
  0x15   :  { %p300_p9 = pnand %p299_p8, %p293_p5 }
  0x17   :  { %303 = shalt.err (!%p300_p9)
}
  0x18   :  { %34 = dma.hbm_to_vmem [thread:$0]  %s372_s1, 1024, %s29_s20, [#allocation6], %s331_s15, %s331_s15, %s332_s16  }
  0x19   :  { %324 = dma.done.wait [#allocation3], 128  }
  0x1a   :  { %325 = vsyncadd [#allocation3], 4294967168 }
  0x1b   :  { %326 = dma.done.wait [#allocation6], 1024  }
  0x1c   :  { %327 = vsyncadd [#allocation6], 4294966272  ;;  %v334_v0 = vmov 0.0   ;;  %vm335_vm0 = vmmov 0   ;;  %v255_v1 = vld [vmem:[#allocation5 + $0x38] sm:$0xff]   ;;  %v256_v2 = vld [vmem:[#allocation5 + $0x30] sm:$0xff]  }
  0x1d   :  { %226 = vmatprep.subr.bf16.mxu0 %v334_v0  ;;  %242 = vmatprep.mubr.msk.bf16.mxu0 %vm335_vm0, %v334_v0  ;;  %v257_v3 = vld [vmem:[#allocation5 + $0x28] sm:$0xff]   ;;  %v258_v4 = vld [vmem:[#allocation5 + $0x20] sm:$0xff]   ;;  %v259_v5 = vld [vmem:[#allocation5 + $0x18] sm:$0xff]   ;;  %s336_s24 = smov [#allocation7]  }
  0x1e   :  { %227 = vmatpush3.bf16.msra.mxu0 %v255_v1  ;;  %v260_v6 = vld [vmem:[#allocation5 + $0x10] sm:$0xff]   ;;  %v261_v7 = vld [vmem:[#allocation5 + $0x8] sm:$0xff]   ;;  %v262_v8 = vld [vmem:[#allocation5] sm:$0xff]   ;;  %s194_s25 = sshll.u32 %s336_s24, 4  ;;  %s195_s25 = int_to_ptr.vmem [resolvable:$true] %s194_s25 }
  0x1f   :  { %228 = vmatprep.subr.bf16.mxu0 %v334_v0  ;;  %v263_v9 = vld [vmem:[#allocation2] sm:$0xff]   ;;  %s304_s26 = scalar_lea.vmem %s195_s25, 256  ;;  %p309_p11 = scmp.lt.s32.totalorder %s195_s25, %s195_s25 }
  0x20   :  { %v216_v10 = vld [vmem:[%s373_s2] ss:$0 sm:$0xff]  ;;  %p305_p10 = scmp.ne.s32.totalorder %s195_s25, %s304_s26  ;;  %p310_p12 = scmp.lt.s32.totalorder %s304_s26, %s304_s26 }
  0x22   :  { %229 = vmatpush3.bf16.msra.mxu0 %v256_v2  ;;  %p311_p13 = por %p310_p12, %p309_p11 }
  0x23   :  { %230 = vmatprep.subr.bf16.mxu0 %v334_v0 }
  0x24   :  { %p312_p0 = pnand %p311_p13, %p305_p10 }
  0x26   :  { %231 = vmatpush3.bf16.msra.mxu0 %v257_v3 }
  0x27   :  { %232 = vmatprep.subr.bf16.mxu0 %v334_v0 }
  0x2a   :  { %233 = vmatpush3.bf16.msra.mxu0 %v258_v4 }
  0x2b   :  { %234 = vmatprep.subr.bf16.mxu0 %v334_v0 }
  0x2e   :  { %235 = vmatpush3.bf16.msra.mxu0 %v259_v5 }
  0x2f   :  { %236 = vmatprep.subr.bf16.mxu0 %v334_v0 }
  0x32   :  { %237 = vmatpush3.bf16.msra.mxu0 %v260_v6 }
  0x33   :  { %238 = vmatprep.subr.bf16.mxu0 %v334_v0 }
  0x36   :  { %239 = vmatpush3.bf16.msra.mxu0 %v261_v7 }
  0x37   :  { %240 = vmatprep.subr.bf16.mxu0 %v334_v0 }
  0x3a   :  { %241 = vmatpush3.bf16.msra.mxu0 %v262_v8 }
  0x3d   :  { %243 = vmatmul.mubr.bf16.vlgmr.msra.gmra.mxu0 %v263_v9 }
  0xfd   :  { %v150_v11 = vpop.f32.mrf.mxu0 }
  0xfe   :  { %v185_v12 = vadd.f32 %v216_v10, %v150_v11 }
  0xff   :  { %v244_v13 = vpop.f32.mrf.mxu0 }
 0x100   :  { %187 = vst [vmem:[#allocation7] sm:$0xff] %v185_v12 }
 0x101   :  { %v153_v14 = vpop.f32.mrf.mxu0 }
 0x102   :  { %v186_v15 = vadd.f32 %v216_v10, %v153_v14 }
 0x103   :  { %v245_v16 = vpop.f32.mrf.mxu0 }
 0x104   :  { %188 = vst [vmem:[#allocation7 + $0x8] sm:$0xff] %v186_v15 }
 0x105   :  { %315 = shalt.err (!%p312_p0)
}
 0x106   :  { %s337_s27 = smov 128   ;;  %s338_s2 = smov 8  }
 0x107   :  { %200 = dma.vmem_to_hbm [thread:$0]  %s195_s25, 256, %s374_s3, [#allocation4], %s337_s27, %s337_s27, %s338_s2  }
 0x108   :  { %328 = dma.done.wait [#allocation4], 256  }
 0x109   :  { %329 = vsyncadd [#allocation4], 4294967040 }
 0x10a   :  { %204 = vsyncpa [#allocation3], 1 }
 0x10b   :  { %205 = vsyncpa [#allocation6], 1 }
 0x10c   :  { %206 = vsyncpa [#allocation4], 1 }

</bundles_post_ra>
